<compile_context>
chip_gen: v6e
topology: v6e:2x2x1
jax: 0.10.0
libtpu: 0.0.40
codegen_flags: <defaults>
</compile_context>

<pallas_src>
import functools

import numpy as np
import jax
import jax.numpy as jnp
from jax import lax
from jax.experimental import pallas as pl
from jax.experimental.pallas import tpu as pltpu


def _round_up(x, m):
    return ((x + m - 1) // m) * m


# ---------------------------------------------------------------------------
# Kernel 1: attention + hidden state (single step; everything resident in VMEM)
# ---------------------------------------------------------------------------
def _attn_hidden_kernel(qe_ref, me_ref, wi_ref, bi_ref, wg_ref, bg_ref,
                        attn_ref, hg_ref, *, n_mem):
    qe = qe_ref[...]                                   # (Qp, E)  bf16
    me = me_ref[...]                                   # (Mp, E)  bf16

    # scores = qe @ me.T, contracting the last axes (no transpose relayout).
    scores = lax.dot_general(qe, me, (((1,), (1,)), ((), ())),
                             preferred_element_type=jnp.float32)    # (Qp, Mp)

    # Mask padded memories in-kernel (n_mem is static; no HBM mask array).
    col = lax.broadcasted_iota(jnp.int32, scores.shape, 1)
    scores = jnp.where(col < n_mem, scores, -1e30)

    # softmax over memories (PyTorch Softmax(dim=1)); exact f32 normalization.
    s_max = jnp.max(scores, axis=-1, keepdims=True)
    e = jnp.exp(scores - s_max)
    attn = e / jnp.sum(e, axis=-1, keepdims=True)
    attn_ref[...] = attn

    # weighted memory readout
    wm = jnp.dot(attn.astype(jnp.bfloat16), me,
                 preferred_element_type=jnp.float32)                 # (Qp, E)

    # hidden_state = G(I(qe) + wm)
    pre = (jnp.dot(qe, wi_ref[...], preferred_element_type=jnp.float32)
           + bi_ref[...] + wm)
    hg = (jnp.dot(pre.astype(jnp.bfloat16), wg_ref[...],
                  preferred_element_type=jnp.float32)
          + bg_ref[...])
    hg_ref[...] = hg                                                 # f32


# ---------------------------------------------------------------------------
# Kernel 2: output projection; vocab-tiled ("parallel" axis), W_O streamed
# ---------------------------------------------------------------------------
def _output_proj_kernel(hg_ref, wo_ref, bo_ref, out_ref):
    out_ref[...] = (jnp.dot(hg_ref[...].astype(jnp.bfloat16), wo_ref[...],
                            preferred_element_type=jnp.float32)
                    + bo_ref[...]).astype(out_ref.dtype)


def _choose_vocab_tile(vocab, hidden, *, n_buffers=3, budget_bytes=12 << 20):
    """Pick the vocab tile width from a VMEM budget (review: keep TV >= 1024)."""
    per_col = n_buffers * hidden * 2               # bf16 W_O columns in flight
    tv = budget_bytes // per_col
    tv = max(1024, min(tv, 8192))
    tv = (tv // 128) * 128
    tv = min(tv, _round_up(vocab, 128))            # don't over-tile tiny vocabs
    return int(tv)


def memory_network_forward(query_ids, memory_ids, params,
                           logits_dtype=jnp.bfloat16):
    emb = params["embedding"]                      # (V, E) f32
    # TODO(synk): embedding row-gather left to XLA (jnp.take); fuse into the
    # kernel with PrefetchScalarGridSpec + pl.Element row gathers if Q/M grow.
    qe = jnp.take(emb, query_ids, axis=0)          # (Q, E)
    me = jnp.take(emb, memory_ids, axis=0)         # (M, E)

    Q, E = qe.shape
    M = me.shape[0]
    H = params["W_G"].shape[0]
    V = params["W_O"].shape[1]
    assert params["W_I"].shape == (E, H)
    assert E == H, "original forward (I(q) + weighted_memories) requires E == H"
    # TODO(synk): E/H that are not multiples of 128 would need zero-padded
    # weight matrices; not required for this module's configuration.
    assert E % 128 == 0 and H % 128 == 0

    # ---- padding / tiling ----------------------------------------------------
    Qp = _round_up(Q, 8)
    Mp = _round_up(M, 128)
    TV = _choose_vocab_tile(V, H)
    Vp = _round_up(V, TV)                          # pad vocab to a multiple of TV
    num_tiles = Vp // TV
    n_buf = int(min(3, max(2, num_tiles)))         # Buffered(3) when useful

    qe_b = jnp.pad(qe, ((0, Qp - Q), (0, 0))).astype(jnp.bfloat16)
    me_b = jnp.pad(me, ((0, Mp - M), (0, 0))).astype(jnp.bfloat16)

    W_I = params["W_I"].astype(jnp.bfloat16)
    b_I = params["b_I"].astype(jnp.float32)
    W_G = params["W_G"].astype(jnp.bfloat16)
    b_G = params["b_G"].astype(jnp.float32)
    W_O = jnp.pad(params["W_O"], ((0, 0), (0, Vp - V))).astype(jnp.bfloat16)
    b_O = jnp.pad(params["b_O"], ((0, 0), (0, Vp - V))).astype(jnp.float32)

    # ---- kernel 1: attention + hidden state (all operands resident) ----------
    prologue_flops = 2 * Qp * (2 * Mp * E + E * H + H * H)
    prologue_bytes = int(qe_b.size * 2 + me_b.size * 2 + W_I.size * 2 +
                         b_I.size * 4 + W_G.size * 2 + b_G.size * 4 +
                         Qp * Mp * 4 + Qp * H * 4)

    attn_p, hg = pl.pallas_call(
        functools.partial(_attn_hidden_kernel, n_mem=M),
        grid=(1,),
        in_specs=[
            pl.BlockSpec((Qp, E), lambda i: (0, 0)),    # qe
            pl.BlockSpec((Mp, E), lambda i: (0, 0)),    # me
            pl.BlockSpec((E, H), lambda i: (0, 0)),     # W_I
            pl.BlockSpec((1, H), lambda i: (0, 0)),     # b_I
            pl.BlockSpec((H, H), lambda i: (0, 0)),     # W_G
            pl.BlockSpec((1, H), lambda i: (0, 0)),     # b_G
        ],
        out_specs=[
            pl.BlockSpec((Qp, Mp), lambda i: (0, 0)),   # attention
            pl.BlockSpec((Qp, H), lambda i: (0, 0)),    # hidden state (f32)
        ],
        out_shape=(
            jax.ShapeDtypeStruct((Qp, Mp), jnp.float32),
            jax.ShapeDtypeStruct((Qp, H), jnp.float32),
        ),
        compiler_params=pltpu.CompilerParams(
            dimension_semantics=("arbitrary",)),
        cost_estimate=pl.CostEstimate(
            flops=prologue_flops, transcendentals=Qp * Mp,
            bytes_accessed=prologue_bytes),
    )(qe_b, me_b, W_I, b_I, W_G, b_G)

    # ---- kernel 2: output projection, streamed over the vocab ---------------
    out_itemsize = jnp.dtype(logits_dtype).itemsize
    proj_bytes = int(Qp * H * 4 + H * Vp * 2 + Vp * 4 + Qp * Vp * out_itemsize)
    vmem_need = (n_buf * (H * TV * 2 + TV * 4)     # streamed W_O + b_O buffers
                 + 2 * Qp * TV * out_itemsize      # double-buffered output tiles
                 + Qp * H * 4)                     # resident h_g
    vmem_limit = int(min(48 << 20, max(vmem_need + (4 << 20), 16 << 20)))

    out_p = pl.pallas_call(
        _output_proj_kernel,
        grid=(num_tiles,),
        in_specs=[
            pl.BlockSpec((Qp, H), lambda j: (0, 0)),     # h_g   (resident)
            pl.BlockSpec((H, TV), lambda j: (0, j),      # W_O   (streamed)
                         pipeline_mode=pl.Buffered(n_buf)),
            pl.BlockSpec((1, TV), lambda j: (0, j),      # b_O   (streamed)
                         pipeline_mode=pl.Buffered(n_buf)),
        ],
        out_specs=pl.BlockSpec((Qp, TV), lambda j: (0, j)),
        out_shape=jax.ShapeDtypeStruct((Qp, Vp), logits_dtype),
        compiler_params=pltpu.CompilerParams(
            dimension_semantics=("parallel",),           # megacore-shardable (v7x)
            vmem_limit_bytes=vmem_limit),
        cost_estimate=pl.CostEstimate(
            flops=2 * Qp * H * Vp, transcendentals=0,
            bytes_accessed=proj_bytes),
    )(hg, W_O, b_O)

    return out_p[:Q, :V], attn_p[:Q, :M]


def reference_forward(query_ids, memory_ids, p):
    qe = p["embedding"][query_ids]
    me = p["embedding"][memory_ids]
    attn = jax.nn.softmax(qe @ me.T, axis=1)
    wm = attn @ me
    h = (qe @ p["W_I"] + p["b_I"] + wm) @ p["W_G"] + p["b_G"]
    out = h @ p["W_O"] + p["b_O"]
    return out, attn


def init_params(key, vocab_size, embedding_dim, hidden_dim):
    ks = jax.random.split(key, 7)
    scale = 0.02
    return {
        "embedding": jax.random.normal(ks[0], (vocab_size, embedding_dim), jnp.float32) * scale,
        "W_I": jax.random.normal(ks[1], (embedding_dim, hidden_dim), jnp.float32) * scale,
        "b_I": jax.random.normal(ks[2], (1, hidden_dim), jnp.float32) * scale,
        "W_G": jax.random.normal(ks[3], (hidden_dim, hidden_dim), jnp.float32) * scale,
        "b_G": jax.random.normal(ks[4], (1, hidden_dim), jnp.float32) * scale,
        "W_O": jax.random.normal(ks[5], (hidden_dim, vocab_size), jnp.float32) * scale,
        "b_O": jax.random.normal(ks[6], (1, vocab_size), jnp.float32) * scale,
    }


if __name__ == "__main__":
    # Tokenizer-sized vocab (mpnet ~30.5K) exercises the streamed, multi-tile,
    # Buffered(3) projection path; Q/M/E/H stay small.  The original module
    # only type-checks with embedding_dim == hidden_dim, so EMB == HID here.
    VOCAB = 30522
    EMB = 128       # embedding_dim
    HID = 128       # hidden_dim (must equal EMB for the original forward)
    Q = 8           # number of query tokens
    M = 16          # number of memory tokens (padded to 128 inside the wrapper)

    key = jax.random.PRNGKey(0)
    k_params, k_q, k_m = jax.random.split(key, 3)
    params = init_params(k_params, VOCAB, EMB, HID)
    query_ids = jax.random.randint(k_q, (Q,), 0, VOCAB, dtype=jnp.int32)
    memory_ids = jax.random.randint(k_m, (M,), 0, VOCAB, dtype=jnp.int32)

    out, attn = memory_network_forward(query_ids, memory_ids, params)
    out = jax.block_until_ready(out)
    attn = jax.block_until_ready(attn)

    ref_out, ref_attn = reference_forward(query_ids, memory_ids, params)
    # bf16 weights/activations + bf16 logits output => slightly loose tolerances
    np.testing.assert_allclose(np.asarray(attn, dtype=np.float32),
                               np.asarray(ref_attn), rtol=2e-2, atol=1e-3)
    np.testing.assert_allclose(np.asarray(out, dtype=np.float32),
                               np.asarray(ref_out), rtol=2e-2, atol=2e-3)

    print("KERNEL_OK")
</pallas_src>

<mosaic_0001>
module attributes {stable_mosaic.version = 11 : i64} {
  func.func @_attn_hidden_kernel(%arg0: i32, %arg1: memref<8x128xbf16, #tpu.memory_space<vmem>>, %arg2: memref<128x128xbf16, #tpu.memory_space<vmem>>, %arg3: memref<128x128xbf16, #tpu.memory_space<vmem>>, %arg4: memref<1x128xf32, #tpu.memory_space<vmem>>, %arg5: memref<128x128xbf16, #tpu.memory_space<vmem>>, %arg6: memref<1x128xf32, #tpu.memory_space<vmem>>, %arg7: memref<8x128xf32, #tpu.memory_space<vmem>>, %arg8: memref<8x128xf32, #tpu.memory_space<vmem>>) attributes {dimension_semantics = [#tpu.dimension_semantics<arbitrary>], iteration_bounds = array<i64: 1>, scalar_prefetch = 0 : i64, scratch_operands = 0 : i64, tpu.core_type = #tpu.core_type<tc>, window_params = [{pipeline_mode = #tpu.pipeline_mode<synchronous>, transform_indices = @transform_0, window_bounds = array<i64: 8, 128>}, {pipeline_mode = #tpu.pipeline_mode<synchronous>, transform_indices = @transform_1, window_bounds = array<i64: 128, 128>}, {pipeline_mode = #tpu.pipeline_mode<synchronous>, transform_indices = @transform_2, window_bounds = array<i64: 128, 128>}, {pipeline_mode = #tpu.pipeline_mode<synchronous>, transform_indices = @transform_3, window_bounds = array<i64: 1, 128>}, {pipeline_mode = #tpu.pipeline_mode<synchronous>, transform_indices = @transform_4, window_bounds = array<i64: 128, 128>}, {pipeline_mode = #tpu.pipeline_mode<synchronous>, transform_indices = @transform_5, window_bounds = array<i64: 1, 128>}, {pipeline_mode = #tpu.pipeline_mode<synchronous>, transform_indices = @transform_6, window_bounds = array<i64: 8, 128>}, {pipeline_mode = #tpu.pipeline_mode<synchronous>, transform_indices = @transform_7, window_bounds = array<i64: 8, 128>}]} {
    %c0 = arith.constant 0 : index
    %c0_0 = arith.constant 0 : index
    %0 = vector.load %arg1[%c0, %c0_0] : memref<8x128xbf16, #tpu.memory_space<vmem>>, vector<8x128xbf16>
    %c0_1 = arith.constant 0 : index
    %c0_2 = arith.constant 0 : index
    %1 = vector.load %arg2[%c0_1, %c0_2] : memref<128x128xbf16, #tpu.memory_space<vmem>>, vector<128x128xbf16>
    %cst = arith.constant dense<0.000000e+00> : vector<8x128xf32>
    %2 = tpu.matmul %0, %1, %cst {dimension_numbers = #tpu.dot_dimension_numbers<[1], [1], [0], [0], [0, 0, 1, 0], [], []>} : vector<8x128xbf16>, vector<128x128xbf16>, vector<8x128xf32> -> vector<8x128xf32>
    %3 = tpu.iota {dimensions = array<i32: 1>} : vector<8x128xi32>
    %c16_i32 = arith.constant 16 : i32
    %4 = vector.broadcast %c16_i32 : i32 to vector<8x128xi32>
    %5 = arith.cmpi slt, %3, %4 : vector<8x128xi32>
    %cst_3 = arith.constant -1.000000e+30 : f32
    %6 = vector.broadcast %cst_3 : f32 to vector<8x128xf32>
    %7 = arith.select %5, %2, %6 : vector<8x128xi1>, vector<8x128xf32>
    %cst_4 = arith.constant dense<0xFF800000> : vector<8xf32>
    %8 = vector.multi_reduction <maximumf>, %7, %cst_4 [1] : vector<8x128xf32> to vector<8xf32>
    %9 = vector.shape_cast %8 : vector<8xf32> to vector<8x1xf32>
    %10 = vector.broadcast %9 : vector<8x1xf32> to vector<8x128xf32>
    %11 = arith.subf %7, %10 : vector<8x128xf32>
    %12 = math.exp %11 : vector<8x128xf32>
    %cst_5 = arith.constant dense<0.000000e+00> : vector<8xf32>
    %13 = vector.multi_reduction <add>, %12, %cst_5 [1] : vector<8x128xf32> to vector<8xf32>
    %14 = vector.shape_cast %13 : vector<8xf32> to vector<8x1xf32>
    %15 = vector.broadcast %14 : vector<8x1xf32> to vector<8x128xf32>
    %16 = arith.divf %12, %15 : vector<8x128xf32>
    %c0_6 = arith.constant 0 : index
    %c0_7 = arith.constant 0 : index
    %17 = vector.load %arg7[%c0_6, %c0_7] : memref<8x128xf32, #tpu.memory_space<vmem>>, vector<8x128xf32>
    tpu.vector_store %arg7[%c0_6, %c0_7], %16 {strides = array<i32>} : memref<8x128xf32, #tpu.memory_space<vmem>>, vector<8x128xf32>,
    %18 = arith.truncf %16 : vector<8x128xf32> to vector<8x128xbf16>
    %cst_8 = arith.constant dense<0.000000e+00> : vector<8x128xf32>
    %19 = tpu.matmul %18, %1, %cst_8 {dimension_numbers = #tpu.dot_dimension_numbers<[1], [0], [0], [1], [0, 0, 1, 1], [], []>} : vector<8x128xbf16>, vector<128x128xbf16>, vector<8x128xf32> -> vector<8x128xf32>
    %c0_9 = arith.constant 0 : index
    %c0_10 = arith.constant 0 : index
    %20 = vector.load %arg3[%c0_9, %c0_10] : memref<128x128xbf16, #tpu.memory_space<vmem>>, vector<128x128xbf16>
    %cst_11 = arith.constant dense<0.000000e+00> : vector<8x128xf32>
    %21 = tpu.matmul %0, %20, %cst_11 {dimension_numbers = #tpu.dot_dimension_numbers<[1], [0], [0], [1], [0, 0, 1, 1], [], []>} : vector<8x128xbf16>, vector<128x128xbf16>, vector<8x128xf32> -> vector<8x128xf32>
    %c0_12 = arith.constant 0 : index
    %c0_13 = arith.constant 0 : index
    %22 = vector.load %arg4[%c0_12, %c0_13] : memref<1x128xf32, #tpu.memory_space<vmem>>, vector<1x128xf32>
    %23 = vector.broadcast %22 : vector<1x128xf32> to vector<8x128xf32>
    %24 = arith.addf %21, %23 : vector<8x128xf32>
    %25 = arith.addf %24, %19 : vector<8x128xf32>
    %26 = arith.truncf %25 : vector<8x128xf32> to vector<8x128xbf16>
    %c0_14 = arith.constant 0 : index
    %c0_15 = arith.constant 0 : index
    %27 = vector.load %arg5[%c0_14, %c0_15] : memref<128x128xbf16, #tpu.memory_space<vmem>>, vector<128x128xbf16>
    %cst_16 = arith.constant dense<0.000000e+00> : vector<8x128xf32>
    %28 = tpu.matmul %26, %27, %cst_16 {dimension_numbers = #tpu.dot_dimension_numbers<[1], [0], [0], [1], [0, 0, 1, 1], [], []>} : vector<8x128xbf16>, vector<128x128xbf16>, vector<8x128xf32> -> vector<8x128xf32>
    %c0_17 = arith.constant 0 : index
    %c0_18 = arith.constant 0 : index
    %29 = vector.load %arg6[%c0_17, %c0_18] : memref<1x128xf32, #tpu.memory_space<vmem>>, vector<1x128xf32>
    %30 = vector.broadcast %29 : vector<1x128xf32> to vector<8x128xf32>
    %31 = arith.addf %28, %30 : vector<8x128xf32>
    %c0_19 = arith.constant 0 : index
    %c0_20 = arith.constant 0 : index
    %32 = vector.load %arg8[%c0_19, %c0_20] : memref<8x128xf32, #tpu.memory_space<vmem>>, vector<8x128xf32>
    tpu.vector_store %arg8[%c0_19, %c0_20], %31 {strides = array<i32>} : memref<8x128xf32, #tpu.memory_space<vmem>>, vector<8x128xf32>,
    return
  }
  func.func @transform_0(%arg0: i32) -> (i32, i32) {
    %c0_i32 = arith.constant 0 : i32
    %c0_i32_0 = arith.constant 0 : i32
    %c0_i32_1 = arith.constant 0 : i32
    return %c0_i32, %c0_i32_0 : i32, i32
  }
  func.func @transform_1(%arg0: i32) -> (i32, i32) {
    %c0_i32 = arith.constant 0 : i32
    %c0_i32_0 = arith.constant 0 : i32
    %c0_i32_1 = arith.constant 0 : i32
    return %c0_i32, %c0_i32_0 : i32, i32
  }
  func.func @transform_2(%arg0: i32) -> (i32, i32) {
    %c0_i32 = arith.constant 0 : i32
    %c0_i32_0 = arith.constant 0 : i32
    %c0_i32_1 = arith.constant 0 : i32
    return %c0_i32, %c0_i32_0 : i32, i32
  }
  func.func @transform_3(%arg0: i32) -> (i32, i32) {
    %c0_i32 = arith.constant 0 : i32
    %c0_i32_0 = arith.constant 0 : i32
    %c0_i32_1 = arith.constant 0 : i32
    return %c0_i32, %c0_i32_0 : i32, i32
  }
  func.func @transform_4(%arg0: i32) -> (i32, i32) {
    %c0_i32 = arith.constant 0 : i32
    %c0_i32_0 = arith.constant 0 : i32
    %c0_i32_1 = arith.constant 0 : i32
    return %c0_i32, %c0_i32_0 : i32, i32
  }
  func.func @transform_5(%arg0: i32) -> (i32, i32) {
    %c0_i32 = arith.constant 0 : i32
    %c0_i32_0 = arith.constant 0 : i32
    %c0_i32_1 = arith.constant 0 : i32
    return %c0_i32, %c0_i32_0 : i32, i32
  }
  func.func @transform_6(%arg0: i32) -> (i32, i32) {
    %c0_i32 = arith.constant 0 : i32
    %c0_i32_0 = arith.constant 0 : i32
    %c0_i32_1 = arith.constant 0 : i32
    return %c0_i32, %c0_i32_0 : i32, i32
  }
  func.func @transform_7(%arg0: i32) -> (i32, i32) {
    %c0_i32 = arith.constant 0 : i32
    %c0_i32_0 = arith.constant 0 : i32
    %c0_i32_1 = arith.constant 0 : i32
    return %c0_i32, %c0_i32_0 : i32, i32
  }
}

</mosaic_0001>

<bundles_post_ra>
// kernel: tpu_custom_call.1
= control target key start
LH: loop header
LB: loop body
LE: loop exit
PB: predicated region body
PF: predicated region fallthrough
CT: control target
= control target key end

     0   :  { %13 = vsyncpa [#allocation3], 0  ;;  %s930_s0 = inlined_call_operand.hbm [shape: bf16[8,128], index: 0, kind: input, shape index: {}]   ;;  %s931_s1 = inlined_call_operand.hbm [shape: bf16[128,128], index: 1, kind: input, shape index: {}]   ;;  %s932_s2 = inlined_call_operand.hbm [shape: bf16[128,128], index: 2, kind: input, shape index: {}]   ;;  %s933_s3 = inlined_call_operand.vmem [shape: f32[1,128], index: 3, kind: input, shape index: {}]   ;;  %s934_s4 = inlined_call_operand.hbm [shape: bf16[128,128], index: 4, kind: input, shape index: {}]   ;;  %s935_s5 = inlined_call_operand.vmem [shape: f32[1,128], index: 5, kind: input, shape index: {}]   ;;  %s936_s6 = inlined_call_operand.hbm [shape: f32[8,128], index: 6, kind: output, shape index: {0}]   ;;  %s937_s7 = inlined_call_operand.hbm [shape: f32[8,128], index: 7, kind: output, shape index: {1}]  }
   0x1   :  { %14 = vsyncpa [#allocation6], 0 }
   0x2   :  { %15 = vsyncpa [#allocation9], 0 }
   0x3   :  { %16 = vsyncpa [#allocation4], 0 }
   0x4   :  { %17 = vsyncpa [#allocation12], 0  ;;  %s807_s24 = smov [#allocation5]  }
   0x5   :  { %s33_s25 = sshll.u32 %s807_s24, 4  ;;  %s34_s25 = int_to_ptr.vmem [resolvable:$true] %s33_s25 }
   0x6   :  { %s685_s26 = scalar_lea.vmem %s34_s25, 1024  ;;  %p690_p1 = scmp.lt.s32.totalorder %s34_s25, %s34_s25 }
   0x7   :  { %p686_p0 = scmp.ne.s32.totalorder %s34_s25, %s685_s26  ;;  %p691_p2 = scmp.lt.s32.totalorder %s685_s26, %s685_s26 }
   0x9   :  { %p692_p3 = por %p691_p2, %p690_p1 }
   0xb   :  { %p693_p4 = pnand %p692_p3, %p686_p0 }
   0xd   :  { %696 = shalt.err (!%p693_p4)
}
   0xe   :  { %s808_s27 = smov 64   ;;  %s809_s28 = smov 4  }
   0xf   :  { %39 = dma.hbm_to_vmem [thread:$0]  %s931_s1, 1024, %s34_s25, [#allocation6], %s808_s27, %s808_s27, %s809_s28  }
  0x10   :  { %s810_s8 = smov [#allocation2]   ;;  %s811_s10 = smov [#allocation7]  }
  0x11   :  { %s24_s9 = sshll.u32 %s810_s8, 4  ;;  %s45_s11 = sshll.u32 %s811_s10, 4  ;;  %s25_s9 = int_to_ptr.vmem [resolvable:$true] %s24_s9  ;;  %s46_s11 = int_to_ptr.vmem [resolvable:$true] %s45_s11 }
  0x12   :  { %s705_s12 = scalar_lea.vmem %s25_s9, 64  ;;  %p710_p6 = scmp.lt.s32.totalorder %s25_s9, %s25_s9 }
  0x13   :  { %p706_p5 = scmp.ne.s32.totalorder %s25_s9, %s705_s12  ;;  %p711_p7 = scmp.lt.s32.totalorder %s705_s12, %s705_s12 }
  0x15   :  { %p712_p8 = por %p711_p7, %p710_p6 }
  0x17   :  { %p713_p9 = pnand %p712_p8, %p706_p5 }
  0x19   :  { %716 = shalt.err (!%p713_p9)
}
  0x1a   :  { %27 = dma.hbm_to_vmem [thread:$0]  %s930_s0, 64, %s25_s9, [#allocation3]  }
  0x1b   :  { %s725_s15 = scalar_lea.vmem %s46_s11, 1024  ;;  %p730_p11 = scmp.lt.s32.totalorder %s46_s11, %s46_s11 }
  0x1c   :  { %p726_p10 = scmp.ne.s32.totalorder %s46_s11, %s725_s15  ;;  %p731_p12 = scmp.lt.s32.totalorder %s725_s15, %s725_s15 }
  0x1e   :  { %p732_p13 = por %p731_p12, %p730_p11 }
  0x20   :  { %p733_p0 = pnand %p732_p13, %p726_p10 }
  0x22   :  { %736 = shalt.err (!%p733_p0)
}
  0x23   :  { %51 = dma.hbm_to_vmem [thread:$0]  %s932_s2, 1024, %s46_s11, [#allocation6], %s808_s27, %s808_s27, %s809_s28  }
  0x24   :  { %s812_s17 = smov [#allocation8]  }
  0x25   :  { %s59_s18 = sshll.u32 %s812_s17, 4  ;;  %s60_s18 = int_to_ptr.vmem [resolvable:$true] %s59_s18 }
  0x26   :  { %s745_s19 = scalar_lea.vmem %s60_s18, 1024  ;;  %p750_p2 = scmp.lt.s32.totalorder %s60_s18, %s60_s18 }
  0x27   :  { %p746_p1 = scmp.ne.s32.totalorder %s60_s18, %s745_s19  ;;  %p751_p3 = scmp.lt.s32.totalorder %s745_s19, %s745_s19 }
  0x29   :  { %p752_p4 = por %p751_p3, %p750_p2 }
  0x2b   :  { %p753_p5 = pnand %p752_p4, %p746_p1 }
  0x2d   :  { %756 = shalt.err (!%p753_p5)
}
  0x2e   :  { %65 = dma.hbm_to_vmem [thread:$0]  %s934_s4, 1024, %s60_s18, [#allocation9], %s808_s27, %s808_s27, %s809_s28  }
  0x2f   :  { %797 = dma.done.wait [#allocation3], 64  }
  0x30   :  { %798 = vsyncadd [#allocation3], 4294967232 }
  0x31   :  { %799 = dma.done.wait [#allocation6], 2048  }
  0x32   :  { %800 = vsyncadd [#allocation6], 4294965248 }
  0x33   :  { %801 = dma.done.wait [#allocation9], 1024  }
  0x34   :  { %802 = vsyncadd [#allocation9], 4294966272  ;;  %v813_v0 = vmov 0.0   ;;  %vm814_vm0 = vmmov 0   ;;  %v649_v1 = vld [vmem:[#allocation5 + $0x38] sm:$0xff]   ;;  %v650_v2 = vld [vmem:[#allocation5 + $0x30] sm:$0xff]   ;;  %v186_v10 = vlaneseq }
  0x35   :  { %559 = vmatprep.subr.bf16.mxu0 %v813_v0  ;;  %575 = vmatprep.mubr.msk.bf16.mxu0 %vm814_vm0, %v813_v0  ;;  %v651_v3 = vld [vmem:[#allocation5 + $0x28] sm:$0xff]   ;;  %v652_v4 = vld [vmem:[#allocation5 + $0x20] sm:$0xff]   ;;  %v653_v5 = vld [vmem:[#allocation5 + $0x18] sm:$0xff]   ;;  %s815_s21 = smov [#allocation10]  }
  0x36   :  { %579 = vmatprep.subr.bf16.mxu1 %v813_v0  ;;  %595 = vmatprep.mubr.msk.bf16.mxu1 %vm814_vm0, %v813_v0  ;;  %v654_v6 = vld [vmem:[#allocation5 + $0x10] sm:$0xff]   ;;  %v655_v7 = vld [vmem:[#allocation5 + $0x8] sm:$0xff]   ;;  %v656_v8 = vld [vmem:[#allocation5] sm:$0xff]   ;;  %v187_v11 = vand.u32 127, %v186_v10  ;;  %s472_s22 = sshll.u32 %s815_s21, 4  ;;  %s473_s22 = int_to_ptr.vmem [resolvable:$true] %s472_s22 }
  0x37   :  { %560 = vmatpush3.bf16.xpose.msra.mxu0 %v649_v1  ;;  %580 = vmatpush3.bf16.msra.mxu1 %v649_v1  ;;  %v81_v9 = vld [vmem:[#allocation2] sm:$0xf]  ;;  %v658_v26 = vld [vmem:[#allocation7 + $0x30] sm:$0xff]   ;;  %v659_v27 = vld [vmem:[#allocation7 + $0x28] sm:$0xff]   ;;  %s757_s23 = scalar_lea.vmem %s473_s22, 128  ;;  %p762_p7 = scmp.lt.s32.totalorder %s473_s22, %s473_s22 }
  0x38   :  { %561 = vmatprep.subr.bf16.mxu0 %v813_v0  ;;  %581 = vmatprep.subr.bf16.mxu1 %v813_v0  ;;  %vm188_vm1 = vcmp.lt.s32.totalorder %v187_v11, 16  ;;  %v657_v24 = vld [vmem:[#allocation7 + $0x38] sm:$0xff]   ;;  %v660_v28 = vld [vmem:[#allocation7 + $0x20] sm:$0xff]   ;;  %v662_v30 = vld [vmem:[#allocation7 + $0x10] sm:$0xff]   ;;  %p758_p6 = scmp.ne.s32.totalorder %s473_s22, %s757_s23  ;;  %p763_p8 = scmp.lt.s32.totalorder %s757_s23, %s757_s23 }
  0x39   :  { %v661_v29 = vld [vmem:[#allocation7 + $0x18] sm:$0xff]   ;;  %v663_v31 = vld [vmem:[#allocation7 + $0x8] sm:$0xff]   ;;  %v664_v32 = vld [vmem:[#allocation7] sm:$0xff]  }
  0x3a   :  { %v665_v33 = vld [vmem:[#allocation8 + $0x38] sm:$0xff]   ;;  %v666_v34 = vld [vmem:[#allocation8 + $0x30] sm:$0xff]   ;;  %v667_v35 = vld [vmem:[#allocation8 + $0x28] sm:$0xff]   ;;  %p764_p9 = por %p763_p8, %p762_p7 }
  0x3b   :  { %582 = vmatpush3.bf16.msra.mxu1 %v650_v2  ;;  %v668_v36 = vld [vmem:[#allocation8 + $0x20] sm:$0xff]   ;;  %v669_v37 = vld [vmem:[#allocation8 + $0x18] sm:$0xff]   ;;  %v670_v38 = vld [vmem:[#allocation8 + $0x10] sm:$0xff]  }
  0x3c   :  { %583 = vmatprep.subr.bf16.mxu1 %v813_v0  ;;  %v671_v39 = vld [vmem:[#allocation8 + $0x8] sm:$0xff]   ;;  %v672_v40 = vld [vmem:[#allocation8] sm:$0xff]   ;;  %v505_v45 = vld [vmem:[%s933_s3] ss:$0 sm:$0xff]  ;;  %p765_p10 = pnand %p764_p9, %p758_p6 }
  0x3f   :  { %562 = vmatpush3.bf16.xpose.msra.mxu0 %v650_v2  ;;  %584 = vmatpush3.bf16.msra.mxu1 %v651_v3 }
  0x40   :  { %563 = vmatprep.subr.bf16.mxu0 %v813_v0  ;;  %585 = vmatprep.subr.bf16.mxu1 %v813_v0 }
  0x43   :  { %586 = vmatpush3.bf16.msra.mxu1 %v652_v4 }
  0x44   :  { %587 = vmatprep.subr.bf16.mxu1 %v813_v0 }
  0x47   :  { %564 = vmatpush3.bf16.xpose.msra.mxu0 %v651_v3  ;;  %588 = vmatpush3.bf16.msra.mxu1 %v653_v5 }
  0x48   :  { %565 = vmatprep.subr.bf16.mxu0 %v813_v0  ;;  %589 = vmatprep.subr.bf16.mxu1 %v813_v0 }
  0x4b   :  { %590 = vmatpush3.bf16.msra.mxu1 %v654_v6 }
  0x4c   :  { %591 = vmatprep.subr.bf16.mxu1 %v813_v0 }
  0x4f   :  { %566 = vmatpush3.bf16.xpose.msra.mxu0 %v652_v4  ;;  %592 = vmatpush3.bf16.msra.mxu1 %v655_v7 }
  0x50   :  { %567 = vmatprep.subr.bf16.mxu0 %v813_v0  ;;  %593 = vmatprep.subr.bf16.mxu1 %v813_v0 }
  0x53   :  { %594 = vmatpush3.bf16.msra.mxu1 %v656_v8 }
  0x54   :  { %599 = vmatprep.subr.bf16.mxu1 %v813_v0 }
  0x57   :  { %568 = vmatpush3.bf16.xpose.msra.mxu0 %v653_v5 }
  0x58   :  { %569 = vmatprep.subr.bf16.mxu0 %v813_v0 }
  0x5f   :  { %570 = vmatpush3.bf16.xpose.msra.mxu0 %v654_v6 }
  0x60   :  { %571 = vmatprep.subr.bf16.mxu0 %v813_v0 }
  0x67   :  { %572 = vmatpush3.bf16.xpose.msra.mxu0 %v655_v7 }
  0x68   :  { %573 = vmatprep.subr.bf16.mxu0 %v813_v0 }
  0x6f   :  { %574 = vmatpush3.bf16.xpose.msra.mxu0 %v656_v8 }
  0x70   :  { %619 = vmatprep.subr.bf16.mxu0 %v813_v0 }
  0x76   :  { %576 = vmatmul.mubr.bf16.vlgmr.msra.gmra.mxu0 %v81_v9 }
  0x77   :  { %635 = vmatprep.mubr.msk.bf16.mxu0 %vm814_vm0, %v813_v0  ;;  %620 = vmatpush3.bf16.msra.mxu0 %v665_v33 }
  0x78   :  { %621 = vmatprep.subr.bf16.mxu0 %v813_v0 }
  0x7b   :  { %622 = vmatpush3.bf16.msra.mxu0 %v666_v34 }
  0x7c   :  { %623 = vmatprep.subr.bf16.mxu0 %v813_v0 }
  0x7f   :  { %624 = vmatpush3.bf16.msra.mxu0 %v667_v35 }
  0x80   :  { %625 = vmatprep.subr.bf16.mxu0 %v813_v0 }
  0x83   :  { %626 = vmatpush3.bf16.msra.mxu0 %v668_v36 }
  0x84   :  { %627 = vmatprep.subr.bf16.mxu0 %v813_v0 }
  0x87   :  { %628 = vmatpush3.bf16.msra.mxu0 %v669_v37 }
  0x88   :  { %629 = vmatprep.subr.bf16.mxu0 %v813_v0 }
  0x8b   :  { %630 = vmatpush3.bf16.msra.mxu0 %v670_v38 }
  0x8c   :  { %631 = vmatprep.subr.bf16.mxu0 %v813_v0 }
  0x8f   :  { %632 = vmatpush3.bf16.msra.mxu0 %v671_v39 }
  0x90   :  { %633 = vmatprep.subr.bf16.mxu0 %v813_v0 }
  0x93   :  { %634 = vmatpush3.bf16.msra.mxu0 %v672_v40 }
 0x136   :  { %v180_v12 = vpop.f32.mrf.mxu0 }
 0x137   :  { %v189_v13 = vsel %vm188_vm1, %v180_v12, -1e+30 }
 0x138   :  { %190 = vmax.xlane.f32.xlu0 %v189_v13  ;;  %v577_v14 = vpop.f32.mrf.mxu0 }
 0x13a   :  { %v183_v15 = vpop.f32.mrf.mxu0 }
 0x13c   :  { %v578_v16 = vpop.f32.mrf.mxu0 }
 0x1c1   :  { %v191_v17 = vpop.xlane.xlu0 %190 }
 0x1c2   :  { %v192_v18 = vsub.f32 %v189_v13, %v191_v17 }
 0x1c4   :  { %v193_v19 = vmul.f32 1.442695, %v192_v18 }
 0x1c6   :  { %673 = vpow2.f32 %v193_v19 }
 0x1d3   :  { %v674_v20 = vpop.eup %673 }
 0x1d4   :  { %195 = vadd.xlane.f32.xlu0 %v674_v20 }
 0x25d   :  { %v196_v21 = vpop.xlane.xlu0 %195 }
 0x25e   :  { %675 = vrcp.f32 %v196_v21 }
 0x26b   :  { %v676_v22 = vpop.eup %675 }
 0x26c   :  { %v198_v23 = vmul.f32 %v676_v22, %v674_v20 }
 0x26e   :  { %v200_v25 = vpack.c.bf16 %v198_v23, %v198_v23  ;;  %199 = vst [vmem:[#allocation10] sm:$0xff] %v198_v23 }
 0x270   :  { %596 = vmatmul.mubr.bf16.vlgmr.msra.gmra.mxu1 %v200_v25 }
 0x271   :  { %600 = vmatpush3.bf16.msra.mxu1 %v657_v24  ;;  %615 = vmatprep.mubr.msk.bf16.mxu1 %vm814_vm0, %v813_v0 }
 0x272   :  { %601 = vmatprep.subr.bf16.mxu1 %v813_v0 }
 0x275   :  { %602 = vmatpush3.bf16.msra.mxu1 %v658_v26 }
 0x276   :  { %603 = vmatprep.subr.bf16.mxu1 %v813_v0 }
 0x279   :  { %604 = vmatpush3.bf16.msra.mxu1 %v659_v27 }
 0x27a   :  { %605 = vmatprep.subr.bf16.mxu1 %v813_v0 }
 0x27d   :  { %606 = vmatpush3.bf16.msra.mxu1 %v660_v28 }
 0x27e   :  { %607 = vmatprep.subr.bf16.mxu1 %v813_v0 }
 0x281   :  { %608 = vmatpush3.bf16.msra.mxu1 %v661_v29 }
 0x282   :  { %609 = vmatprep.subr.bf16.mxu1 %v813_v0 }
 0x285   :  { %610 = vmatpush3.bf16.msra.mxu1 %v662_v30 }
 0x286   :  { %611 = vmatprep.subr.bf16.mxu1 %v813_v0 }
 0x289   :  { %612 = vmatpush3.bf16.msra.mxu1 %v663_v31 }
 0x28a   :  { %613 = vmatprep.subr.bf16.mxu1 %v813_v0 }
 0x28d   :  { %614 = vmatpush3.bf16.msra.mxu1 %v664_v32 }
 0x290   :  { %616 = vmatmul.mubr.bf16.vlgmr.msra.gmra.mxu1 %v81_v9 }
 0x330   :  { %v235_v41 = vpop.f32.mrf.mxu1 }
 0x332   :  { %v597_v42 = vpop.f32.mrf.mxu1 }
 0x334   :  { %v238_v43 = vpop.f32.mrf.mxu1 }
 0x336   :  { %v598_v44 = vpop.f32.mrf.mxu1 }
 0x350   :  { %v346_v46 = vpop.f32.mrf.mxu1 }
 0x351   :  { %v347_v47 = vadd.f32 %v505_v45, %v346_v46 }
 0x352   :  { %v617_v48 = vpop.f32.mrf.mxu1 }
 0x353   :  { %v352_v49 = vadd.f32 %v347_v47, %v235_v41 }
 0x354   :  { %v349_v50 = vpop.f32.mrf.mxu1 }
 0x355   :  { %v353_v51 = vpack.c.bf16 %v352_v49, %v352_v49 }
 0x356   :  { %v618_v52 = vpop.f32.mrf.mxu1 }
 0x357   :  { %636 = vmatmul.mubr.bf16.vlgmr.msra.gmra.mxu0 %v353_v51 }
 0x358   :  { %768 = shalt.err (!%p765_p10)
}
 0x359   :  { %475 = dma.vmem_to_hbm [thread:$0]  %s473_s22, 128, %s936_s6, [#allocation4]   ;;  %v514_v53 = vld [vmem:[%s935_s5] ss:$0 sm:$0xff] }
 0x35a   :  { %s816_s27 = smov [#allocation11]  }
 0x35b   :  { %s482_s28 = sshll.u32 %s816_s27, 4  ;;  %s483_s28 = int_to_ptr.vmem [resolvable:$true] %s482_s28 }
 0x35c   :  { %s777_s29 = scalar_lea.vmem %s483_s28, 128  ;;  %p782_p12 = scmp.lt.s32.totalorder %s483_s28, %s483_s28 }
 0x35d   :  { %p778_p11 = scmp.ne.s32.totalorder %s483_s28, %s777_s29  ;;  %p783_p13 = scmp.lt.s32.totalorder %s777_s29, %s777_s29 }
 0x35f   :  { %p784_p0 = por %p783_p13, %p782_p12 }
 0x361   :  { %p785_p1 = pnand %p784_p0, %p778_p11 }
 0x417   :  { %v459_v54 = vpop.f32.mrf.mxu0 }
 0x418   :  { %v460_v55 = vadd.f32 %v514_v53, %v459_v54 }
 0x419   :  { %v637_v56 = vpop.f32.mrf.mxu0 }
 0x41a   :  { %465 = vst [vmem:[#allocation11] sm:$0xff] %v460_v55 }
 0x41b   :  { %v462_v57 = vpop.f32.mrf.mxu0 }
 0x41c   :  { %788 = shalt.err (!%p785_p1)
}
 0x41d   :  { %485 = dma.vmem_to_hbm [thread:$0]  %s483_s28, 128, %s937_s7, [#allocation12]   ;;  %v638_v58 = vpop.f32.mrf.mxu0 }
 0x41e   :  { %803 = dma.done.wait [#allocation4], 128  }
 0x41f   :  { %804 = vsyncadd [#allocation4], 4294967168 }
 0x420   :  { %805 = dma.done.wait [#allocation12], 128  }
 0x421   :  { %806 = vsyncadd [#allocation12], 4294967168 }
 0x422   :  { %492 = vsyncpa [#allocation3], 1 }
 0x423   :  { %493 = vsyncpa [#allocation6], 1 }
 0x424   :  { %494 = vsyncpa [#allocation9], 1 }
 0x425   :  { %495 = vsyncpa [#allocation4], 1 }
 0x426   :  { %496 = vsyncpa [#allocation12], 1 }

</bundles_post_ra>
